<compile_context>
chip_gen: v7x
topology: tpu7x:2x2x1
jax: 0.10.0
libtpu: 0.0.40
codegen_flags: <defaults>
</compile_context>

<pallas_src>
import jax
import jax.numpy as jnp
from jax import lax
from jax.experimental import pallas as pl
from jax.experimental.pallas import tpu as pltpu


# ----------------------------- Pallas kernels ------------------------------ #

def cam_kernel(w_ref, act_ref, cam_ref):
    # w_ref:   (1, 1, 1, tc) f32  Grad-CAM channel weights for this C-tile.
    # act_ref: (1, tc, tl)   bf16 activation tile of one image.
    # cam_ref: (1, 1, tl)    f32  resident output block (doubles as accumulator).
    c_idx = pl.program_id(2)

    @pl.when(c_idx == 0)
    def _():
        cam_ref[...] = jnp.zeros_like(cam_ref)

    act = act_ref[0]                                    # (tc, tl) bf16
    w = w_ref[0, 0].astype(act.dtype)                   # (1, tc)  bf16 for MXU

    # C-contraction on the MXU (vmatmul slot), f32 accumulate.
    partial = lax.dot_general(
        w, act, dimension_numbers=(((1,), (0,)), ((), ())),
        preferred_element_type=jnp.float32)             # (1, tl)
    cam_ref[0] += partial

    @pl.when(c_idx == pl.num_programs(2) - 1)
    def _():
        cam_ref[...] = jnp.maximum(cam_ref[...], 0.0)   # np.maximum(cam, 0)


def norm_kernel(x_ref, o_ref):
    # Final scale_cam_image (per-image min/max normalize) on a sublane-dense slab.
    x = x_ref[0]                                        # (rows, cols) f32
    mn = jnp.min(jnp.min(x, axis=-1, keepdims=True), axis=-2, keepdims=True)
    x = x - mn
    mx = jnp.max(jnp.max(x, axis=-1, keepdims=True), axis=-2, keepdims=True)
    # EUP reciprocal instead of a VALU divide.
    o_ref[0] = x * pl.reciprocal(mx + 1e-7, approx=True)


# ----------------------------- tiling helpers ------------------------------ #

def _round_up(x, m):
    return -(-x // m) * m


def _pick_tiles(C, L, act_itemsize):
    """Choose (L-tile, C-tile) and padded C from the chip's VMEM capacity."""
    try:
        vmem_cap = int(pltpu.get_tpu_info().vmem_capacity_bytes)
    except Exception:  # interpret mode / non-TPU fallback
        vmem_cap = 64 << 20
    # Double-buffered activation tiles get ~1/4 of physical VMEM:
    # 32 MiB on 128 MiB parts (v5e/v6e), 16 MiB on 64 MiB v7x.
    in_budget = min(32 << 20, vmem_cap // 4)

    # L tile: multiple of 128 lanes (or the full L).  Prefer >= 2 L-tiles so the
    # "parallel" L axis can shard batch-1 work across v7x's two TensorCores.
    tl = L // 2 if (L % 256 == 0) else L
    while tl % 256 == 0 and 2 * 16 * tl * act_itemsize > in_budget:
        tl //= 2
    n_lt = L // tl

    # C tile: multiple of 16 sublanes (bf16 packing), sized to the budget.
    # C is padded up (never a silent tc=1 fallback for awkward C).
    per_chan = 2 * tl * act_itemsize                    # one channel, 2 buffers
    max_tc = max(16, (in_budget // per_chan) // 16 * 16)
    tc = min(_round_up(C, 16), max_tc)
    c_pad = _round_up(C, tc)
    n_ct = c_pad // tc
    return tl, n_lt, tc, c_pad, n_ct, vmem_cap


# ----------------------------- Pallas wrappers ------------------------------ #

def pallas_cam(acts_ncl, w_nc):
    """get_cam_image (channel-weighted sum over C) + ReLU."""
    N, C, L = acts_ncl.shape
    itemsize = jnp.dtype(acts_ncl.dtype).itemsize
    tl, n_lt, tc, c_pad, n_ct, vmem_cap = _pick_tiles(C, L, itemsize)

    if c_pad != C:
        # Zero-padded channels contribute nothing (weights padded with zeros).
        acts_ncl = jnp.pad(acts_ncl, ((0, 0), (0, c_pad - C), (0, 0)))
        w_nc = jnp.pad(w_nc, ((0, 0), (0, c_pad - C)))
    w_blk = w_nc.reshape(N, n_ct, 1, tc)                # tiny (N*C_pad) f32 array

    params = {"dimension_semantics": ("parallel", "parallel", "arbitrary")}
    vmem_need = 2 * tc * tl * itemsize + 2 * tl * 4 + 2 * tc * 4
    if vmem_need > (10 << 20):
        # Raise the scoped-VMEM default when tiles are big, with headroom derived
        # from the chip's physical capacity (~38 MiB cap on 64 MiB v7x).
        params["vmem_limit_bytes"] = int(min(2 * vmem_need, (vmem_cap * 3) // 5))

    return pl.pallas_call(
        cam_kernel,
        out_shape=jax.ShapeDtypeStruct((N, 1, L), jnp.float32),
        grid_spec=pltpu.PrefetchScalarGridSpec(
            num_scalar_prefetch=0,
            grid=(N, n_lt, n_ct),
            in_specs=[
                pl.BlockSpec((1, 1, 1, tc), lambda n, lt, ct: (n, ct, 0, 0)),
                pl.BlockSpec((1, tc, tl), lambda n, lt, ct: (n, ct, lt)),
            ],
            out_specs=pl.BlockSpec((1, 1, tl), lambda n, lt, ct: (n, 0, lt)),
        ),
        compiler_params=pltpu.CompilerParams(**params),
    )(w_blk, acts_ncl)


def pallas_scale(cam_nl):
    """Final scale_cam_image: per-image (x - min) / (max + 1e-7)."""
    N, L = cam_nl.shape
    rows = 8 if L % 8 == 0 else 1                       # sublane-dense when possible
    cols = L // rows
    x = cam_nl.reshape(N, rows, cols)
    out = pl.pallas_call(
        norm_kernel,
        out_shape=jax.ShapeDtypeStruct((N, rows, cols), jnp.float32),
        grid=(N,),
        in_specs=[pl.BlockSpec((1, rows, cols), lambda n: (n, 0, 0))],
        out_specs=pl.BlockSpec((1, rows, cols), lambda n: (n, 0, 0)),
        compiler_params=pltpu.CompilerParams(dimension_semantics=("parallel",)),
    )(x)
    return out.reshape(N, L)


# --------------------------- base model (glue) ------------------------------ #

class TinyModel:
    """Deterministic synthetic base model: conv (target layer) -> GAP -> linear."""

    def __init__(self, key, in_ch=3, feat_ch=8, num_classes=2):
        k1, k2, k3, k4 = jax.random.split(key, 4)
        self.conv_w = 0.1 * jax.random.normal(k1, (feat_ch, in_ch, 3, 3), jnp.float32)
        self.conv_b = 0.1 * jax.random.normal(k2, (feat_ch,), jnp.float32)
        self.fc_w = 0.1 * jax.random.normal(k3, (feat_ch, num_classes), jnp.float32)
        self.fc_b = 0.1 * jax.random.normal(k4, (num_classes,), jnp.float32)

    def target_layer(self, x):                        # NCHW -> NCHW (bf16 acts)
        y = lax.conv_general_dilated(
            x, self.conv_w, window_strides=(1, 1), padding="SAME",
            dimension_numbers=("NCHW", "OIHW", "NCHW"))
        # Emit bf16 directly: the cast fuses into the conv epilogue, so HBM only
        # ever holds bf16 activations for the memory-bound Pallas kernel.
        return jax.nn.relu(y + self.conv_b[None, :, None, None]).astype(jnp.bfloat16)

    def head(self, act):                              # activations -> logits (f32)
        pooled = jnp.mean(act.astype(jnp.float32), axis=(2, 3))
        return pooled @ self.fc_w + self.fc_b


# ----------------------------- CAM forward ---------------------------------- #

def cam_forward(model, x, flip=False):
    # Forward hook: capture target-layer activations.
    acts = model.target_layer(x)                      # (N, C, H, W) bf16
    logits = model.head(acts)                         # (N, num_classes) f32

    # torch.max(outputs, 1); predicted.item()  -- kept as a traced scalar so the
    # whole forward (model + both pallas calls + resize) stays in one jit.
    # TODO(synk): like .item() in the reference, image 0's prediction is used for
    # the whole batch; the PyTorch module is batch-1 by construction.
    pred = jnp.argmax(logits[0])
    if flip:                                          # params['flip']
        pred = 1 - pred

    # Backward hook: d logits[:, pred] / d activations (one-hot logit select).
    onehot = jax.nn.one_hot(pred, logits.shape[-1], dtype=jnp.float32)
    grads = jax.grad(lambda a: jnp.sum(model.head(a) * onehot))(acts)

    N, C, H, W = acts.shape
    h_in, w_in = x.shape[-2], x.shape[-1]

    # Grad-CAM channel weights hoisted out of the Pallas kernel: the memory-bound
    # kernel never streams the gradient tensor; XLA fuses this reduction into the
    # backward pass.
    # TODO(synk): CAM.get_cam_image is abstract in the PyTorch base class; the
    # canonical Grad-CAM weighting (spatial mean of grads) is used.
    w_nc = jnp.mean(grads.astype(jnp.float32), axis=(2, 3))      # (N, C)

    # get_cam_image weighted channel sum + ReLU (Pallas kernel 1).
    cam = pallas_cam(acts.reshape(N, C, H * W), w_nc).reshape(N, H, W)

    # scale_cam_image resize to target_size = (W_in, H_in).  The pre-resize
    # normalization of the reference is folded into the final normalize
    # (bilinear resize is affine; ~1e-7 eps-level difference).
    # TODO(synk): cv2.resize INTER_LINEAR approximated by jax.image.resize bilinear.
    cam = jax.image.resize(cam, (N, h_in, w_in), method="bilinear")

    # Final scale_cam_image (normalize only), Pallas kernel 2 on a sublane-dense slab.
    cam = pallas_scale(cam.reshape(N, h_in * w_in))
    return cam.reshape(N, h_in, w_in)                 # (N, H_in, W_in) float32


def reference_cam(model, x, flip=False):
    """Pure-JAX reference in the PyTorch op order:
    weighted sum -> ReLU -> normalize -> resize -> normalize (f32 weights)."""
    acts = model.target_layer(x).astype(jnp.float32)
    logits = model.head(acts)
    pred = jnp.argmax(logits[0])
    if flip:
        pred = 1 - pred
    onehot = jax.nn.one_hot(pred, logits.shape[-1], dtype=jnp.float32)
    grads = jax.grad(lambda a: jnp.sum(model.head(a) * onehot))(acts)
    w = jnp.mean(grads, axis=(2, 3))                               # (N, C)
    cam = jnp.maximum(jnp.einsum("nc,nchw->nhw", w, acts), 0.0)

    def _norm(c):
        mn = c.min(axis=(1, 2), keepdims=True)
        c = c - mn
        mx = c.max(axis=(1, 2), keepdims=True)
        return c / (mx + 1e-7)

    cam = _norm(cam)
    cam = jax.image.resize(cam, (x.shape[0], x.shape[-2], x.shape[-1]),
                           method="bilinear")
    return _norm(cam)


if __name__ == "__main__":
    key = jax.random.PRNGKey(0)
    kx, km = jax.random.split(key)

    # Batch 1 (the PyTorch module calls .item() on the prediction), NCHW input.
    x = jax.random.normal(kx, (1, 3, 16, 16), jnp.float32)
    model = TinyModel(km)

    cam_fn = jax.jit(lambda inp: cam_forward(model, inp, flip=False))
    cam = jax.block_until_ready(cam_fn(x))
    assert cam.shape == (1, 16, 16) and cam.dtype == jnp.float32

    ref = jax.block_until_ready(
        jax.jit(lambda inp: reference_cam(model, inp, flip=False))(x))
    err = float(jnp.max(jnp.abs(cam - ref)))
    assert err < 0.1, f"max |pallas - reference| = {err}"
    print("KERNEL_OK")
</pallas_src>

<mosaic_0001>
module attributes {stable_mosaic.version = 11 : i64} {
  func.func @cam_kernel(%arg0: i32, %arg1: i32, %arg2: i32, %arg3: memref<1x1x1x16xf32, #tpu.memory_space<vmem>>, %arg4: memref<1x16x128xbf16, #tpu.memory_space<vmem>>, %arg5: memref<1x1x128xf32, #tpu.memory_space<vmem>>) attributes {dimension_semantics = [#tpu.dimension_semantics<parallel>, #tpu.dimension_semantics<parallel>, #tpu.dimension_semantics<arbitrary>], iteration_bounds = array<i64: 1, 2, 1>, scalar_prefetch = 0 : i64, scratch_operands = 0 : i64, tpu.core_type = #tpu.core_type<tc>, window_params = [{transform_indices = @transform_0, window_bounds = array<i64: 1, 1, 1, 16>}, {transform_indices = @transform_1, window_bounds = array<i64: 1, 16, 128>}, {transform_indices = @transform_2, window_bounds = array<i64: 1, 1, 128>}]} {
    %c0_i32 = arith.constant 0 : i32
    %0 = arith.cmpi eq, %arg2, %c0_i32 : i32
    %1 = arith.extui %0 : i1 to i32
    %c0_i32_0 = arith.constant 0 : i32
    %2 = arith.cmpi ne, %1, %c0_i32_0 : i32
    scf.if %2 {
      %cst_15 = arith.constant 0.000000e+00 : f32
      %18 = vector.broadcast %cst_15 : f32 to vector<1x1x128xf32>
      %c0_16 = arith.constant 0 : index
      %c0_17 = arith.constant 0 : index
      %c0_18 = arith.constant 0 : index
      %19 = vector.load %arg5[%c0_16, %c0_17, %c0_18] : memref<1x1x128xf32, #tpu.memory_space<vmem>>, vector<1x1x128xf32>
      tpu.vector_store %arg5[%c0_16, %c0_17, %c0_18], %18 {strides = array<i32>} : memref<1x1x128xf32, #tpu.memory_space<vmem>>, vector<1x1x128xf32>,
    } else {
    }
    %c0 = arith.constant 0 : index
    %c0_1 = arith.constant 0 : index
    %c0_2 = arith.constant 0 : index
    %3 = vector.load %arg4[%c0, %c0_1, %c0_2] : memref<1x16x128xbf16, #tpu.memory_space<vmem>>, vector<1x16x128xbf16>
    %4 = vector.shape_cast %3 : vector<1x16x128xbf16> to vector<16x128xbf16>
    %c0_3 = arith.constant 0 : index
    %c0_4 = arith.constant 0 : index
    %c0_5 = arith.constant 0 : index
    %c0_6 = arith.constant 0 : index
    %5 = vector.load %arg3[%c0_3, %c0_4, %c0_5, %c0_6] : memref<1x1x1x16xf32, #tpu.memory_space<vmem>>, vector<1x1x1x16xf32>
    %6 = vector.shape_cast %5 : vector<1x1x1x16xf32> to vector<1x16xf32>
    %7 = arith.truncf %6 : vector<1x16xf32> to vector<1x16xbf16>
    %cst = arith.constant dense<0.000000e+00> : vector<1x128xf32>
    %8 = tpu.matmul %7, %4, %cst {dimension_numbers = #tpu.dot_dimension_numbers<[1], [0], [0], [1], [0, 0, 1, 1], [], []>} : vector<1x16xbf16>, vector<16x128xbf16>, vector<1x128xf32> -> vector<1x128xf32>
    %c0_7 = arith.constant 0 : index
    %c0_8 = arith.constant 0 : index
    %c0_9 = arith.constant 0 : index
    %9 = vector.load %arg5[%c0_7, %c0_8, %c0_9] : memref<1x1x128xf32, #tpu.memory_space<vmem>>, vector<1x1x128xf32>
    %10 = vector.shape_cast %9 : vector<1x1x128xf32> to vector<1x128xf32>
    %11 = arith.addf %10, %8 : vector<1x128xf32>
    %c0_10 = arith.constant 0 : index
    %c0_11 = arith.constant 0 : index
    %c0_12 = arith.constant 0 : index
    %12 = vector.load %arg5[%c0_10, %c0_11, %c0_12] : memref<1x1x128xf32, #tpu.memory_space<vmem>>, vector<1x1x128xf32>
    %13 = vector.shape_cast %12 : vector<1x1x128xf32> to vector<1x128xf32>
    %14 = vector.shape_cast %11 : vector<1x128xf32> to vector<1x1x128xf32>
    tpu.vector_store %arg5[%c0_10, %c0_11, %c0_12], %14 {strides = array<i32>} : memref<1x1x128xf32, #tpu.memory_space<vmem>>, vector<1x1x128xf32>,
    %c0_i32_13 = arith.constant 0 : i32
    %15 = arith.cmpi eq, %arg2, %c0_i32_13 : i32
    %16 = arith.extui %15 : i1 to i32
    %c0_i32_14 = arith.constant 0 : i32
    %17 = arith.cmpi ne, %16, %c0_i32_14 : i32
    scf.if %17 {
      %c0_15 = arith.constant 0 : index
      %c0_16 = arith.constant 0 : index
      %c0_17 = arith.constant 0 : index
      %18 = vector.load %arg5[%c0_15, %c0_16, %c0_17] : memref<1x1x128xf32, #tpu.memory_space<vmem>>, vector<1x1x128xf32>
      %cst_18 = arith.constant 0.000000e+00 : f32
      %19 = vector.broadcast %cst_18 : f32 to vector<1x1x128xf32>
      %20 = arith.maximumf %18, %19 : vector<1x1x128xf32>
      %c0_19 = arith.constant 0 : index
      %c0_20 = arith.constant 0 : index
      %c0_21 = arith.constant 0 : index
      %21 = vector.load %arg5[%c0_19, %c0_20, %c0_21] : memref<1x1x128xf32, #tpu.memory_space<vmem>>, vector<1x1x128xf32>
      tpu.vector_store %arg5[%c0_19, %c0_20, %c0_21], %20 {strides = array<i32>} : memref<1x1x128xf32, #tpu.memory_space<vmem>>, vector<1x1x128xf32>,
    } else {
    }
    return
  }
  func.func @transform_0(%arg0: i32, %arg1: i32, %arg2: i32) -> (i32, i32, i32, i32) {
    %c0_i32 = arith.constant 0 : i32
    %c0_i32_0 = arith.constant 0 : i32
    %c0_i32_1 = arith.constant 0 : i32
    return %arg0, %arg2, %c0_i32, %c0_i32_0 : i32, i32, i32, i32
  }
  func.func @transform_1(%arg0: i32, %arg1: i32, %arg2: i32) -> (i32, i32, i32) {
    %c0_i32 = arith.constant 0 : i32
    return %arg0, %arg2, %arg1 : i32, i32, i32
  }
  func.func @transform_2(%arg0: i32, %arg1: i32, %arg2: i32) -> (i32, i32, i32) {
    %c0_i32 = arith.constant 0 : i32
    %c0_i32_0 = arith.constant 0 : i32
    return %arg0, %c0_i32, %arg1 : i32, i32, i32
  }
}

module attributes {stable_mosaic.version = 11 : i64} {
  func.func @norm_kernel(%arg0: i32, %arg1: memref<1x8x32xf32, #tpu.memory_space<vmem>>, %arg2: memref<1x8x32xf32, #tpu.memory_space<vmem>>) attributes {dimension_semantics = [#tpu.dimension_semantics<parallel>], iteration_bounds = array<i64: 1>, scalar_prefetch = 0 : i64, scratch_operands = 0 : i64, tpu.core_type = #tpu.core_type<tc>, window_params = [{transform_indices = @transform_0, window_bounds = array<i64: 1, 8, 32>}, {transform_indices = @transform_1, window_bounds = array<i64: 1, 8, 32>}]} {
    %c0 = arith.constant 0 : index
    %c0_0 = arith.constant 0 : index
    %c0_1 = arith.constant 0 : index
    %0 = vector.load %arg1[%c0, %c0_0, %c0_1] : memref<1x8x32xf32, #tpu.memory_space<vmem>>, vector<1x8x32xf32>
    %1 = vector.shape_cast %0 : vector<1x8x32xf32> to vector<8x32xf32>
    %cst = arith.constant dense<0x7F800000> : vector<8xf32>
    %2 = vector.multi_reduction <minimumf>, %1, %cst [1] : vector<8x32xf32> to vector<8xf32>
    %3 = vector.shape_cast %2 : vector<8xf32> to vector<8x1xf32>
    %cst_2 = arith.constant dense<0x7F800000> : vector<1xf32>
    %4 = vector.multi_reduction <minimumf>, %3, %cst_2 [0] : vector<8x1xf32> to vector<1xf32>
    %5 = vector.shape_cast %4 : vector<1xf32> to vector<1x1xf32>
    %6 = vector.broadcast %5 : vector<1x1xf32> to vector<8x32xf32>
    %7 = arith.subf %1, %6 : vector<8x32xf32>
    %cst_3 = arith.constant dense<0xFF800000> : vector<8xf32>
    %8 = vector.multi_reduction <maximumf>, %7, %cst_3 [1] : vector<8x32xf32> to vector<8xf32>
    %9 = vector.shape_cast %8 : vector<8xf32> to vector<8x1xf32>
    %cst_4 = arith.constant dense<0xFF800000> : vector<1xf32>
    %10 = vector.multi_reduction <maximumf>, %9, %cst_4 [0] : vector<8x1xf32> to vector<1xf32>
    %11 = vector.shape_cast %10 : vector<1xf32> to vector<1x1xf32>
    %cst_5 = arith.constant 1.000000e-07 : f32
    %12 = vector.broadcast %cst_5 : f32 to vector<1x1xf32>
    %13 = arith.addf %11, %12 : vector<1x1xf32>
    %14 = tpu.reciprocal %13 {approx = true} : vector<1x1xf32> -> vector<1x1xf32>
    %15 = vector.broadcast %14 : vector<1x1xf32> to vector<8x32xf32>
    %16 = arith.mulf %7, %15 : vector<8x32xf32>
    %c0_6 = arith.constant 0 : index
    %c0_7 = arith.constant 0 : index
    %c0_8 = arith.constant 0 : index
    %17 = vector.load %arg2[%c0_6, %c0_7, %c0_8] : memref<1x8x32xf32, #tpu.memory_space<vmem>>, vector<1x8x32xf32>
    %18 = vector.shape_cast %17 : vector<1x8x32xf32> to vector<8x32xf32>
    %19 = vector.shape_cast %16 : vector<8x32xf32> to vector<1x8x32xf32>
    tpu.vector_store %arg2[%c0_6, %c0_7, %c0_8], %19 {strides = array<i32>} : memref<1x8x32xf32, #tpu.memory_space<vmem>>, vector<1x8x32xf32>,
    return
  }
  func.func @transform_0(%arg0: i32) -> (i32, i32, i32) {
    %c0_i32 = arith.constant 0 : i32
    %c0_i32_0 = arith.constant 0 : i32
    %c0_i32_1 = arith.constant 0 : i32
    return %arg0, %c0_i32, %c0_i32_0 : i32, i32, i32
  }
  func.func @transform_1(%arg0: i32) -> (i32, i32, i32) {
    %c0_i32 = arith.constant 0 : i32
    %c0_i32_0 = arith.constant 0 : i32
    %c0_i32_1 = arith.constant 0 : i32
    return %arg0, %c0_i32, %c0_i32_0 : i32, i32, i32
  }
}

</mosaic_0001>

<bundles_post_ra>
// kernel: _lambda_.3
= control target key start
LH: loop header
LB: loop body
LE: loop exit
PB: predicated region body
PF: predicated region fallthrough
CT: control target
= control target key end

     0   :  { %vm9_vm0 = vcmask 261120   ;;  %s58_s0 = inlined_call_operand.vmem [shape: f32[1,8,32], index: 0, kind: input, shape index: {}]   ;;  %s59_s1 = inlined_call_operand.vmem [shape: f32[1,8,32], index: 1, kind: output, shape index: {}]  }
   0x1   :  { %v8_v0 = vld [vmem:[%s58_s0] sm:$0xff] }
   0x2   :  { %v10_v1 = vsel %vm9_vm0, %v8_v0, inf }
   0x3   :  { %11 = vmin.xlane.f32.xlu0 %v10_v1 }
  0x90   :  { %v12_v2 = vpop.xlane.xlu0 %11 }
  0x91   :  { %v13_v3 = vrot.slane %v12_v2, 4 }
  0x93   :  { %v14_v4 = vmin.f32 %v12_v2, %v13_v3 }
  0x95   :  { %v15_v5 = vrot.slane %v14_v4, 2 }
  0x97   :  { %v16_v6 = vmin.f32 %v14_v4, %v15_v5 }
  0x99   :  { %v17_v7 = vrot.slane %v16_v6, 1 }
  0x9b   :  { %v18_v8 = vmin.f32 %v16_v6, %v17_v7 }
  0x9d   :  { %v19_v9 = vsub.f32 %v8_v0, %v18_v8 }
  0x9f   :  { %v20_v10 = vsel %vm9_vm0, %v19_v9, -inf }
  0xa0   :  { %21 = vmax.xlane.f32.xlu0 %v20_v10 }
 0x12d   :  { %v22_v11 = vpop.xlane.xlu0 %21 }
 0x12e   :  { %v23_v12 = vrot.slane %v22_v11, 4 }
 0x130   :  { %v24_v13 = vmax.f32 %v22_v11, %v23_v12 }
 0x132   :  { %v25_v14 = vrot.slane %v24_v13, 2 }
 0x134   :  { %v26_v15 = vmax.f32 %v24_v13, %v25_v14 }
 0x136   :  { %v27_v16 = vrot.slane %v26_v15, 1 }
 0x138   :  { %v28_v17 = vmax.f32 %v26_v15, %v27_v16 }
 0x13a   :  { %v29_v18 = vadd.f32 1e-07, %v28_v17 }
 0x13c   :  { %37 = vrcp.f32 %v29_v18 }
 0x146   :  { %v38_v19 = vpop.eup %37 }
 0x147   :  { %v31_v20 = vmul.f32 %v38_v19, %v19_v9 }
 0x149   :  { %32 = vst.msk [vmem:[%s59_s1] sm:$0xff] %vm9_vm0, %v31_v20 }

// kernel: _lambda_.2
= control target key start
LH: loop header
LB: loop body
LE: loop exit
PB: predicated region body
PF: predicated region fallthrough
CT: control target
= control target key end

     0   :  { %s539_s9 = smov 0   ;;  %s541_s10 = smov 0   ;;  %s608_s0 = inlined_call_operand.vmem [shape: f32[1,1,1,16], index: 0, kind: input, shape index: {}]   ;;  %s609_s1 = inlined_call_operand.vmem [shape: bf16[1,16,256], index: 1, kind: input, shape index: {}]   ;;  %s610_s2 = inlined_call_operand.vmem [shape: f32[1,1,256], index: 2, kind: output, shape index: {}]  }
   0x1   :  { %s543_s11 = smov 0   ;;  %s545_s12 = smov 0  }
   0x2   :  { %s547_s13 = smov 0  }
   0x3 LB: > { %s27_s14 = sadd.s32 1, %s516_s12  ;;  %p77_p1 = scmp.ne.s32.totalorder %s508_s10, %s504_s9  ;;  %s520_s13 = sphi %s547_s13, %s12_s13   ;;  %s516_s12 = sphi %s545_s12, %s614_s12   ;;  %s512_s11 = sphi %s543_s11, %s613_s11   ;;  %s508_s10 = sphi %s541_s10, %s612_s10   ;;  %s504_s9 = sphi %s539_s9, %s611_s9  }
   0x4   : > { %p29_p0 = scmp.ge.s32.totalorder %s27_s14, 2  ;;  %p78_p2 = scmp.eq.s32.totalorder %s520_s13, 0 }
   0x5   : > { %s70_s16 = sadd.s32 1, %s508_s10  ;;  %p422_p5 = scmp.ge.s32.totalorder %s520_s13, 2 }
   0x6   : > { %s616_s14 = smov (%p29_p0, %s27_s14), 0  ;;  %p79_p3 = por %p78_p2, %p77_p1 }
   0x7   : > { %s66_s15 = ssub.s32 %s516_s12, %s616_s14  ;;  %140 = sbr.rel (%p422_p5) target bundleno = 21 (0x15), region = 20 }
   0x8   : > { %p68_p4 = scmp.eq.s32.totalorder %s66_s15, 0 }
   0xa   : > { %s574_s17 = scalar_select %p68_p4, %s508_s10, %s70_s16  }
   0xe   : > { %143 = sbr.rel (!%p79_p3) target bundleno = 21 (0x15), region = 24  ;;  %s145_s18 = sand.u32 (%p79_p3), 1, %s508_s10  }
   0xf   : > { %s424_s19 = sshll.u32 (%p79_p3), %s516_s12, 2  ;;  %s423_s20 = sshll.u32 (%p79_p3), %s145_s18, 3 }
  0x10   : > { %s154_s23 = scalar_lea.vmem (%p79_p3), %s609_s1, %s424_s19  ;;  %s147_s24 = scalar_lea.vmem (%p79_p3), [#allocation2], %s423_s20 }
  0x11   : > { %v170_v0 = vld [vmem:[%s154_s23] sm:$0xf] (%p79_p3)  ;;  %v172_v1 = vld [vmem:[%s154_s23 + $0x8] sm:$0xf] (%p79_p3) }
  0x12   : > { %171 = vst [vmem:[%s147_s24] sm:$0xf] (%p79_p3), %v170_v0  ;;  %173 = vst [vmem:[%s147_s24 + $0x4] sm:$0xf] (%p79_p3), %v172_v1 }
  0x15 PF: > { %p425_p6 = scmp.ge.s32.totalorder %s520_s13, 1  ;;  %p199_p7 = scmp.lt.s32.totalorder %s520_s13, 3 }
  0x17   : > { %p200_p8 = pnand %p425_p6, %p199_p7 }
  0x18   : > { %p244_p9 = scmp.lt.s32.totalorder (!%p200_p8), %s512_s11, 1  ;;  %s206_s25 = sand.u32 (!%p200_p8), 1, %s504_s9   ;;  %v522_v2 = vmov (!%p200_p8), 0.0   ;;  %vm523_vm0 = vmmov (!%p200_p8), 0   ;;  %v257_v3 = vld [vmem:[%s608_s0] sm:$0x1] (!%p200_p8) }
  0x19   : > { %203 = sbr.rel (%p200_p8) target bundleno = 256 (0x100), region = 65  ;;  %433 = vmatprep.subr.bf16.mxu0 (!%p200_p8), %v522_v2  ;;  %s426_s26 = sshll.u32 (!%p200_p8), %s206_s25, 3  ;;  %435 = vmatprep.mubr.msk.bf16.mxu0 (!%p200_p8), %vm523_vm0, %v522_v2  ;;  %v258_v5 = vpack.c.bf16 (!%p200_p8), %v257_v3, %v257_v3  ;;  %vm265_vm1 = vcmask (!%p200_p8), 130048  }
  0x1a   : > { %s208_s4 = scalar_lea.vmem (!%p200_p8), [#allocation2], %s426_s26 }
  0x1b   : > { %v481_v4 = vld [vmem:[%s208_s4] sm:$0xff] (!%p200_p8)  }
  0x1c   : > { %434 = vmatpush3.bf16.msra.mxu0 (!%p200_p8), %v481_v4 }
  0x1f   : > { %436 = vmatmul.mubr.msk.bf16.vlgmr.msra.gmra.mrb[0].mxu0 (!%p200_p8), %vm265_vm1, %v258_v5 }
  0x20   : > { %s618_s11 = smov (!%p244_p9, %s512_s11), 1 }
  0x21   : > { %s248_s3 = scalar_lea.vmem %s610_s2, %s618_s11 }
  0x22   : > { %254 = vst [vmem:[%s248_s3] sm:$0x1] %v522_v2 }
  0x29   : > { %v309_v6 = vld [vmem:[%s248_s3] sm:$0x1] }
  0xf2   : > { %v303_v7 = vpop.f32.mrb[0].mxu0 }
  0xf3   : > { %v310_v8 = vadd.f32 %v309_v6, %v303_v7  ;;  %v437_v9 = vpop.f32.mrb[1].mxu0 }
  0xf4   : > { %v306_v10 = vpop.f32.mrb[2].mxu0 }
  0xf5   : > { %311 = vst [vmem:[%s248_s3] sm:$0x1] %v310_v8  ;;  %v438_v11 = vpop.f32.mrb[3].mxu0 }
  0xfc   : > { %v315_v12 = vld [vmem:[%s248_s3] sm:$0x1] }
  0xfd   : > { %v316_v13 = vmax.f32 %v315_v12, 0.0 }
  0xff   : > { %317 = vst [vmem:[%s248_s3] sm:$0x1] %v316_v13 }
 0x100 PF: > { %s12_s13 = sadd.s32 1, %s520_s13   ;;  %s611_s9 = smov %s508_s10 }
 0x101   : > { %p9_p10 = scmp.ge.s32.totalorder %s12_s13, 4   ;;  %s612_s10 = smov %s574_s17 }
 0x102   : > { %s613_s11 = smov %s516_s12  ;;  %s614_s12 = smov %s616_s14 }
 0x103   :  { %11 = sbr.rel (!%p9_p10) target bundleno = 3 (0x3), region = 115 }

</bundles_post_ra>
